<compile_context>
chip_gen: v6e
topology: v6e:2x2x1
jax: 0.10.0
libtpu: 0.0.40
codegen_flags: <defaults>
</compile_context>

<pallas_src>
import jax
import jax.numpy as jnp
from jax.experimental import pallas as pl
from jax.experimental.pallas import tpu as pltpu


def _round_up(x, m):
    return ((x + m - 1) // m) * m


def _discriminator_kernel(xproj_ref,   # (T, TB, Hp) f32  fused (emb @ W_ih^T + b) per step
                          whh_ref,     # (Hp, Hp)    bf16 W_hh^T, zero-padded
                          wlin_ref,    # (Hp, Sp)    bf16 W_lin^T, zero-padded
                          blin_ref,    # (1, Sp)     f32  b_lin, padded lanes = -1e30
                          out_ref):    # (TB, Sp)    f32  softmax probabilities (lane-dense)
    T = xproj_ref.shape[0]
    whh = whh_ref[...]

    # t = 0: initial hidden state is zero, so the recurrent matmul is skipped.
    h = jnp.tanh(xproj_ref[0])                       # (TB, Hp) f32
    h_mxu = h.astype(whh.dtype)                      # bf16 operand for the MXU

    # Serial recurrence; T is static and small -> fully unrolled, h stays in vregs.
    for t in range(1, T):
        pre = xproj_ref[t] + jnp.dot(h_mxu, whh, preferred_element_type=jnp.float32)
        h = jnp.tanh(pre)                            # f32 tanh (PyTorch RNN default)
        h_mxu = h.astype(whh.dtype)                  # cast fused right after tanh

    # Final linear on the last hidden state + exact softmax over the class axis.
    logits = jnp.dot(h_mxu, wlin_ref[...],
                     preferred_element_type=jnp.float32) + blin_ref[...]   # (TB, Sp)
    m = jnp.max(logits, axis=1, keepdims=True)       # padded lanes are -1e30 -> ignored
    e = jnp.exp(logits - m)                          # exp(-1e30) == 0 exactly
    out_ref[...] = e / jnp.sum(e, axis=1, keepdims=True)


def prepare_discriminator_params(emb_table, w_ih, w_hh, b_ih, b_hh, w_lin, b_lin):
    """One-time weight preparation (call at parameter-load time, NOT per forward)."""
    vocab, _ = emb_table.shape
    H = w_hh.shape[0]
    S = w_lin.shape[0]
    Hp = _round_up(max(H, 128), 128)      # hidden width padded to the 128-lane native width
    Sp = _round_up(max(S, 128), 128)      # lane-dense class axis

    # Fused embedding x input-projection table (exact f32). Zero padding is exact:
    # padded hidden units get pre-activation 0 -> tanh(0)=0 and their zeroed
    # outgoing weights contribute nothing downstream.
    fused = (emb_table.astype(jnp.float32) @ jnp.transpose(w_ih).astype(jnp.float32)
             + (b_ih + b_hh).astype(jnp.float32))                        # (vocab, H)
    fused_p = jnp.zeros((vocab, Hp), jnp.float32).at[:, :H].set(fused)

    whh_p = jnp.zeros((Hp, Hp), jnp.bfloat16).at[:H, :H].set(
        jnp.transpose(w_hh).astype(jnp.bfloat16))
    wlin_p = jnp.zeros((Hp, Sp), jnp.bfloat16).at[:H, :S].set(
        jnp.transpose(w_lin).astype(jnp.bfloat16))
    # Padded class lanes get bias -1e30 -> exp underflows to exactly 0, so the
    # softmax over the padded axis equals the softmax over the real S classes.
    blin_p = jnp.full((1, Sp), -1e30, jnp.float32).at[0, :S].set(
        b_lin.astype(jnp.float32))

    return {"fused_emb_proj": fused_p, "whh": whh_p, "wlin": wlin_p,
            "blin": blin_p, "style_dim": S}


def discriminator_forward(x, params, *, batch_tile=128):
    """x: (B, T) int32 token ids.  Returns (B, style_dim) softmax probabilities."""
    B, T = x.shape
    fused = params["fused_emb_proj"]
    whh_p = params["whh"]
    wlin_p = params["wlin"]
    blin_p = params["blin"]
    S = params["style_dim"]
    Hp = whh_p.shape[0]
    Sp = wlin_p.shape[1]

    # Batch tile: multiple of 8 (f32 sublane); pad B up so every tile is full.
    TB = _round_up(max(8, min(batch_tile, _round_up(B, 8))), 8)
    Bp = _round_up(B, TB)
    x_pad = x if Bp == B else jnp.zeros((Bp, T), x.dtype).at[:B, :].set(x)

    # Fused embedding + input-projection lookup: one row-gather of the (vocab, Hp)
    # table in time-major order (replaces gather + cast + in-kernel matmul).
    xproj = fused[x_pad.T]                                               # (T, Bp, Hp) f32

    grid = (Bp // TB,)
    out = pl.pallas_call(
        _discriminator_kernel,
        out_shape=jax.ShapeDtypeStruct((Bp, Sp), jnp.float32),
        grid_spec=pltpu.PrefetchScalarGridSpec(
            num_scalar_prefetch=0,
            grid=grid,
            in_specs=[
                pl.BlockSpec((T, TB, Hp), lambda i: (0, i, 0)),   # xproj: tiled along B
                pl.BlockSpec((Hp, Hp), lambda i: (0, 0)),         # W_hh^T: same block always
                pl.BlockSpec((Hp, Sp), lambda i: (0, 0)),         # W_lin^T
                pl.BlockSpec((1, Sp), lambda i: (0, 0)),          # b_lin
            ],
            out_specs=pl.BlockSpec((TB, Sp), lambda i: (i, 0)),
        ),
        compiler_params=pltpu.CompilerParams(
            dimension_semantics=("parallel",)),
    )(xproj, whh_p, wlin_p, blin_p)

    return out[:B, :S]


def _reference_forward(x, emb_table, w_ih, w_hh, b_ih, b_hh, w_lin, b_lin):
    """Pure-JAX f32 reference matching the PyTorch module semantics."""
    B, T = x.shape
    H = w_hh.shape[0]
    emb = emb_table[x]                                    # (B, T, E)
    h = jnp.zeros((B, H), jnp.float32)
    for t in range(T):
        h = jnp.tanh(emb[:, t, :] @ w_ih.T + b_ih + h @ w_hh.T + b_hh)
    logits = h @ w_lin.T + b_lin
    return jax.nn.softmax(logits, axis=1)


if __name__ == "__main__":
    # Small, deterministic configuration consistent with the module's __init__.
    vocab_size = 50
    embedding_dim = 32   # E
    output_size = 32     # H (RNN hidden size)
    style_dim = 4        # S
    batch = 2            # B
    seq = 8              # T

    key = jax.random.PRNGKey(0)
    keys = jax.random.split(key, 8)

    # Deterministic synthetic parameters (PyTorch-style uniform init scale).
    emb_table = jax.random.normal(keys[0], (vocab_size, embedding_dim), jnp.float32)
    k = 1.0 / jnp.sqrt(jnp.float32(output_size))
    w_ih = jax.random.uniform(keys[1], (output_size, embedding_dim), jnp.float32, -k, k)
    w_hh = jax.random.uniform(keys[2], (output_size, output_size), jnp.float32, -k, k)
    b_ih = jax.random.uniform(keys[3], (output_size,), jnp.float32, -k, k)
    b_hh = jax.random.uniform(keys[4], (output_size,), jnp.float32, -k, k)
    kl = 1.0 / jnp.sqrt(jnp.float32(output_size))
    w_lin = jax.random.uniform(keys[5], (style_dim, output_size), jnp.float32, -kl, kl)
    b_lin = jax.random.uniform(keys[6], (style_dim,), jnp.float32, -kl, kl)

    x = jax.random.randint(keys[7], (batch, seq), 0, vocab_size, jnp.int32)

    # One-time weight preparation (hoisted out of the per-call path).
    params = prepare_discriminator_params(emb_table, w_ih, w_hh, b_ih, b_hh, w_lin, b_lin)
    params = jax.block_until_ready(params)

    probs = discriminator_forward(x, params)
    probs = jax.block_until_ready(probs)

    ref = _reference_forward(x, emb_table, w_ih, w_hh, b_ih, b_hh, w_lin, b_lin)

    assert probs.shape == (batch, style_dim)
    assert bool(jnp.all(jnp.isfinite(probs)))
    # exact softmax divide -> rows sum to 1 tightly
    assert bool(jnp.allclose(jnp.sum(probs, axis=1), 1.0, atol=1e-5))
    # matches the f32 reference within bf16-recurrence tolerance
    assert bool(jnp.allclose(probs, ref, atol=2e-2, rtol=2e-2))

    print("KERNEL_OK")
</pallas_src>

<mosaic_0001>
module attributes {stable_mosaic.version = 11 : i64} {
  func.func @_discriminator_kernel(%arg0: i32, %arg1: memref<8x8x128xf32, #tpu.memory_space<vmem>>, %arg2: memref<128x128xbf16, #tpu.memory_space<vmem>>, %arg3: memref<128x128xbf16, #tpu.memory_space<vmem>>, %arg4: memref<1x128xf32, #tpu.memory_space<vmem>>, %arg5: memref<8x128xf32, #tpu.memory_space<vmem>>) attributes {dimension_semantics = [#tpu.dimension_semantics<parallel>], iteration_bounds = array<i64: 1>, scalar_prefetch = 0 : i64, scratch_operands = 0 : i64, tpu.core_type = #tpu.core_type<tc>, window_params = [{transform_indices = @transform_0, window_bounds = array<i64: 8, 8, 128>}, {pipeline_mode = #tpu.pipeline_mode<synchronous>, transform_indices = @transform_1, window_bounds = array<i64: 128, 128>}, {pipeline_mode = #tpu.pipeline_mode<synchronous>, transform_indices = @transform_2, window_bounds = array<i64: 128, 128>}, {pipeline_mode = #tpu.pipeline_mode<synchronous>, transform_indices = @transform_3, window_bounds = array<i64: 1, 128>}, {transform_indices = @transform_4, window_bounds = array<i64: 8, 128>}]} {
    %c0 = arith.constant 0 : index
    %c0_0 = arith.constant 0 : index
    %0 = vector.load %arg2[%c0, %c0_0] : memref<128x128xbf16, #tpu.memory_space<vmem>>, vector<128x128xbf16>
    %c0_1 = arith.constant 0 : index
    %c0_2 = arith.constant 0 : index
    %c0_3 = arith.constant 0 : index
    %1 = vector.load %arg1[%c0_1, %c0_2, %c0_3] : memref<8x8x128xf32, #tpu.memory_space<vmem>>, vector<1x8x128xf32>
    %2 = vector.shape_cast %1 : vector<1x8x128xf32> to vector<8x128xf32>
    %3 = math.tanh %2 : vector<8x128xf32>
    %4 = arith.truncf %3 : vector<8x128xf32> to vector<8x128xbf16>
    %c1 = arith.constant 1 : index
    %c0_4 = arith.constant 0 : index
    %c0_5 = arith.constant 0 : index
    %5 = vector.load %arg1[%c1, %c0_4, %c0_5] : memref<8x8x128xf32, #tpu.memory_space<vmem>>, vector<1x8x128xf32>
    %6 = vector.shape_cast %5 : vector<1x8x128xf32> to vector<8x128xf32>
    %cst = arith.constant dense<0.000000e+00> : vector<8x128xf32>
    %7 = tpu.matmul %4, %0, %cst {dimension_numbers = #tpu.dot_dimension_numbers<[1], [0], [0], [1], [0, 0, 1, 1], [], []>} : vector<8x128xbf16>, vector<128x128xbf16>, vector<8x128xf32> -> vector<8x128xf32>
    %8 = arith.addf %6, %7 : vector<8x128xf32>
    %9 = math.tanh %8 : vector<8x128xf32>
    %10 = arith.truncf %9 : vector<8x128xf32> to vector<8x128xbf16>
    %c2 = arith.constant 2 : index
    %c0_6 = arith.constant 0 : index
    %c0_7 = arith.constant 0 : index
    %11 = vector.load %arg1[%c2, %c0_6, %c0_7] : memref<8x8x128xf32, #tpu.memory_space<vmem>>, vector<1x8x128xf32>
    %12 = vector.shape_cast %11 : vector<1x8x128xf32> to vector<8x128xf32>
    %cst_8 = arith.constant dense<0.000000e+00> : vector<8x128xf32>
    %13 = tpu.matmul %10, %0, %cst_8 {dimension_numbers = #tpu.dot_dimension_numbers<[1], [0], [0], [1], [0, 0, 1, 1], [], []>} : vector<8x128xbf16>, vector<128x128xbf16>, vector<8x128xf32> -> vector<8x128xf32>
    %14 = arith.addf %12, %13 : vector<8x128xf32>
    %15 = math.tanh %14 : vector<8x128xf32>
    %16 = arith.truncf %15 : vector<8x128xf32> to vector<8x128xbf16>
    %c3 = arith.constant 3 : index
    %c0_9 = arith.constant 0 : index
    %c0_10 = arith.constant 0 : index
    %17 = vector.load %arg1[%c3, %c0_9, %c0_10] : memref<8x8x128xf32, #tpu.memory_space<vmem>>, vector<1x8x128xf32>
    %18 = vector.shape_cast %17 : vector<1x8x128xf32> to vector<8x128xf32>
    %cst_11 = arith.constant dense<0.000000e+00> : vector<8x128xf32>
    %19 = tpu.matmul %16, %0, %cst_11 {dimension_numbers = #tpu.dot_dimension_numbers<[1], [0], [0], [1], [0, 0, 1, 1], [], []>} : vector<8x128xbf16>, vector<128x128xbf16>, vector<8x128xf32> -> vector<8x128xf32>
    %20 = arith.addf %18, %19 : vector<8x128xf32>
    %21 = math.tanh %20 : vector<8x128xf32>
    %22 = arith.truncf %21 : vector<8x128xf32> to vector<8x128xbf16>
    %c4 = arith.constant 4 : index
    %c0_12 = arith.constant 0 : index
    %c0_13 = arith.constant 0 : index
    %23 = vector.load %arg1[%c4, %c0_12, %c0_13] : memref<8x8x128xf32, #tpu.memory_space<vmem>>, vector<1x8x128xf32>
    %24 = vector.shape_cast %23 : vector<1x8x128xf32> to vector<8x128xf32>
    %cst_14 = arith.constant dense<0.000000e+00> : vector<8x128xf32>
    %25 = tpu.matmul %22, %0, %cst_14 {dimension_numbers = #tpu.dot_dimension_numbers<[1], [0], [0], [1], [0, 0, 1, 1], [], []>} : vector<8x128xbf16>, vector<128x128xbf16>, vector<8x128xf32> -> vector<8x128xf32>
    %26 = arith.addf %24, %25 : vector<8x128xf32>
    %27 = math.tanh %26 : vector<8x128xf32>
    %28 = arith.truncf %27 : vector<8x128xf32> to vector<8x128xbf16>
    %c5 = arith.constant 5 : index
    %c0_15 = arith.constant 0 : index
    %c0_16 = arith.constant 0 : index
    %29 = vector.load %arg1[%c5, %c0_15, %c0_16] : memref<8x8x128xf32, #tpu.memory_space<vmem>>, vector<1x8x128xf32>
    %30 = vector.shape_cast %29 : vector<1x8x128xf32> to vector<8x128xf32>
    %cst_17 = arith.constant dense<0.000000e+00> : vector<8x128xf32>
    %31 = tpu.matmul %28, %0, %cst_17 {dimension_numbers = #tpu.dot_dimension_numbers<[1], [0], [0], [1], [0, 0, 1, 1], [], []>} : vector<8x128xbf16>, vector<128x128xbf16>, vector<8x128xf32> -> vector<8x128xf32>
    %32 = arith.addf %30, %31 : vector<8x128xf32>
    %33 = math.tanh %32 : vector<8x128xf32>
    %34 = arith.truncf %33 : vector<8x128xf32> to vector<8x128xbf16>
    %c6 = arith.constant 6 : index
    %c0_18 = arith.constant 0 : index
    %c0_19 = arith.constant 0 : index
    %35 = vector.load %arg1[%c6, %c0_18, %c0_19] : memref<8x8x128xf32, #tpu.memory_space<vmem>>, vector<1x8x128xf32>
    %36 = vector.shape_cast %35 : vector<1x8x128xf32> to vector<8x128xf32>
    %cst_20 = arith.constant dense<0.000000e+00> : vector<8x128xf32>
    %37 = tpu.matmul %34, %0, %cst_20 {dimension_numbers = #tpu.dot_dimension_numbers<[1], [0], [0], [1], [0, 0, 1, 1], [], []>} : vector<8x128xbf16>, vector<128x128xbf16>, vector<8x128xf32> -> vector<8x128xf32>
    %38 = arith.addf %36, %37 : vector<8x128xf32>
    %39 = math.tanh %38 : vector<8x128xf32>
    %40 = arith.truncf %39 : vector<8x128xf32> to vector<8x128xbf16>
    %c7 = arith.constant 7 : index
    %c0_21 = arith.constant 0 : index
    %c0_22 = arith.constant 0 : index
    %41 = vector.load %arg1[%c7, %c0_21, %c0_22] : memref<8x8x128xf32, #tpu.memory_space<vmem>>, vector<1x8x128xf32>
    %42 = vector.shape_cast %41 : vector<1x8x128xf32> to vector<8x128xf32>
    %cst_23 = arith.constant dense<0.000000e+00> : vector<8x128xf32>
    %43 = tpu.matmul %40, %0, %cst_23 {dimension_numbers = #tpu.dot_dimension_numbers<[1], [0], [0], [1], [0, 0, 1, 1], [], []>} : vector<8x128xbf16>, vector<128x128xbf16>, vector<8x128xf32> -> vector<8x128xf32>
    %44 = arith.addf %42, %43 : vector<8x128xf32>
    %45 = math.tanh %44 : vector<8x128xf32>
    %46 = arith.truncf %45 : vector<8x128xf32> to vector<8x128xbf16>
    %c0_24 = arith.constant 0 : index
    %c0_25 = arith.constant 0 : index
    %47 = vector.load %arg3[%c0_24, %c0_25] : memref<128x128xbf16, #tpu.memory_space<vmem>>, vector<128x128xbf16>
    %cst_26 = arith.constant dense<0.000000e+00> : vector<8x128xf32>
    %48 = tpu.matmul %46, %47, %cst_26 {dimension_numbers = #tpu.dot_dimension_numbers<[1], [0], [0], [1], [0, 0, 1, 1], [], []>} : vector<8x128xbf16>, vector<128x128xbf16>, vector<8x128xf32> -> vector<8x128xf32>
    %c0_27 = arith.constant 0 : index
    %c0_28 = arith.constant 0 : index
    %49 = vector.load %arg4[%c0_27, %c0_28] : memref<1x128xf32, #tpu.memory_space<vmem>>, vector<1x128xf32>
    %50 = vector.broadcast %49 : vector<1x128xf32> to vector<8x128xf32>
    %51 = arith.addf %48, %50 : vector<8x128xf32>
    %cst_29 = arith.constant dense<0xFF800000> : vector<8xf32>
    %52 = vector.multi_reduction <maximumf>, %51, %cst_29 [1] : vector<8x128xf32> to vector<8xf32>
    %53 = vector.shape_cast %52 : vector<8xf32> to vector<8x1xf32>
    %54 = vector.broadcast %53 : vector<8x1xf32> to vector<8x128xf32>
    %55 = arith.subf %51, %54 : vector<8x128xf32>
    %56 = math.exp %55 : vector<8x128xf32>
    %cst_30 = arith.constant dense<0.000000e+00> : vector<8xf32>
    %57 = vector.multi_reduction <add>, %56, %cst_30 [1] : vector<8x128xf32> to vector<8xf32>
    %58 = vector.shape_cast %57 : vector<8xf32> to vector<8x1xf32>
    %59 = vector.broadcast %58 : vector<8x1xf32> to vector<8x128xf32>
    %60 = arith.divf %56, %59 : vector<8x128xf32>
    %c0_31 = arith.constant 0 : index
    %c0_32 = arith.constant 0 : index
    %61 = vector.load %arg5[%c0_31, %c0_32] : memref<8x128xf32, #tpu.memory_space<vmem>>, vector<8x128xf32>
    tpu.vector_store %arg5[%c0_31, %c0_32], %60 {strides = array<i32>} : memref<8x128xf32, #tpu.memory_space<vmem>>, vector<8x128xf32>,
    return
  }
  func.func @transform_0(%arg0: i32) -> (i32, i32, i32) {
    %c0_i32 = arith.constant 0 : i32
    %c0_i32_0 = arith.constant 0 : i32
    %c0_i32_1 = arith.constant 0 : i32
    return %c0_i32, %arg0, %c0_i32_0 : i32, i32, i32
  }
  func.func @transform_1(%arg0: i32) -> (i32, i32) {
    %c0_i32 = arith.constant 0 : i32
    %c0_i32_0 = arith.constant 0 : i32
    %c0_i32_1 = arith.constant 0 : i32
    return %c0_i32, %c0_i32_0 : i32, i32
  }
  func.func @transform_2(%arg0: i32) -> (i32, i32) {
    %c0_i32 = arith.constant 0 : i32
    %c0_i32_0 = arith.constant 0 : i32
    %c0_i32_1 = arith.constant 0 : i32
    return %c0_i32, %c0_i32_0 : i32, i32
  }
  func.func @transform_3(%arg0: i32) -> (i32, i32) {
    %c0_i32 = arith.constant 0 : i32
    %c0_i32_0 = arith.constant 0 : i32
    %c0_i32_1 = arith.constant 0 : i32
    return %c0_i32, %c0_i32_0 : i32, i32
  }
  func.func @transform_4(%arg0: i32) -> (i32, i32) {
    %c0_i32 = arith.constant 0 : i32
    %c0_i32_0 = arith.constant 0 : i32
    return %arg0, %c0_i32 : i32, i32
  }
}

</mosaic_0001>

<bundles_post_ra>
// kernel: tpu_custom_call.1
= control target key start
LH: loop header
LB: loop body
LE: loop exit
PB: predicated region body
PF: predicated region fallthrough
CT: control target
= control target key end

     0   :  { %9 = vsyncpa [#allocation3], 0  ;;  %s1162_s0 = inlined_call_operand.hbm [shape: f32[8,8,128], index: 0, kind: input, shape index: {}]   ;;  %s1163_s1 = inlined_call_operand.hbm [shape: bf16[128,128], index: 1, kind: input, shape index: {}]   ;;  %s1164_s2 = inlined_call_operand.hbm [shape: bf16[128,128], index: 2, kind: input, shape index: {}]   ;;  %s1165_s3 = inlined_call_operand.vmem [shape: f32[1,128], index: 3, kind: input, shape index: {}]   ;;  %s1166_s4 = inlined_call_operand.hbm [shape: f32[8,128], index: 4, kind: output, shape index: {}]  }
   0x1   :  { %10 = vsyncpa [#allocation6], 0 }
   0x2   :  { %11 = vsyncpa [#allocation4], 0  ;;  %s960_s15 = smov [#allocation5]  }
   0x3   :  { %s29_s16 = sshll.u32 %s960_s15, 4  ;;  %s30_s16 = int_to_ptr.vmem [resolvable:$true] %s29_s16 }
   0x4   :  { %s882_s17 = scalar_lea.vmem %s30_s16, 1024  ;;  %p887_p1 = scmp.lt.s32.totalorder %s30_s16, %s30_s16 }
   0x5   :  { %p883_p0 = scmp.ne.s32.totalorder %s30_s16, %s882_s17  ;;  %p888_p2 = scmp.lt.s32.totalorder %s882_s17, %s882_s17 }
   0x7   :  { %p889_p3 = por %p888_p2, %p887_p1 }
   0x9   :  { %p890_p4 = pnand %p889_p3, %p883_p0 }
   0xb   :  { %893 = shalt.err (!%p890_p4)
}
   0xc   :  { %s961_s18 = smov 64   ;;  %s962_s19 = smov 4  }
   0xd   :  { %35 = dma.hbm_to_vmem [thread:$0]  %s1163_s1, 1024, %s30_s16, [#allocation6], %s961_s18, %s961_s18, %s962_s19  }
   0xe   :  { %s963_s22 = smov [#allocation2]  }
   0xf   :  { %s17_s23 = sshll.u32 %s963_s22, 4  ;;  %s18_s23 = int_to_ptr.vmem [resolvable:$true] %s17_s23 }
  0x10   :  { %s902_s24 = scalar_lea.vmem %s18_s23, 1024  ;;  %p907_p6 = scmp.lt.s32.totalorder %s18_s23, %s18_s23 }
  0x11   :  { %p903_p5 = scmp.ne.s32.totalorder %s18_s23, %s902_s24  ;;  %p908_p7 = scmp.lt.s32.totalorder %s902_s24, %s902_s24 }
  0x13   :  { %p909_p8 = por %p908_p7, %p907_p6 }
  0x15   :  { %p910_p9 = pnand %p909_p8, %p903_p5 }
  0x17   :  { %913 = shalt.err (!%p910_p9)
}
  0x18   :  { %s964_s25 = smov 128   ;;  %s965_s26 = smov 8  }
  0x19   :  { %23 = dma.hbm_to_vmem [thread:$0]  %s1162_s0, 1024, %s18_s23, [#allocation3], %s964_s25, %s964_s25, %s965_s26  }
  0x1a   :  { %s966_s29 = smov [#allocation7]  }
  0x1b   :  { %s41_s30 = sshll.u32 %s966_s29, 4  ;;  %s42_s30 = int_to_ptr.vmem [resolvable:$true] %s41_s30 }
  0x1c   :  { %s922_s1 = scalar_lea.vmem %s42_s30, 1024  ;;  %p927_p11 = scmp.lt.s32.totalorder %s42_s30, %s42_s30 }
  0x1d   :  { %p923_p10 = scmp.ne.s32.totalorder %s42_s30, %s922_s1  ;;  %p928_p12 = scmp.lt.s32.totalorder %s922_s1, %s922_s1 }
  0x1f   :  { %p929_p13 = por %p928_p12, %p927_p11 }
  0x21   :  { %p930_p0 = pnand %p929_p13, %p923_p10 }
  0x23   :  { %933 = shalt.err (!%p930_p0)
}
  0x24   :  { %47 = dma.hbm_to_vmem [thread:$0]  %s1164_s2, 1024, %s42_s30, [#allocation6], %s961_s18, %s961_s18, %s962_s19  }
  0x25   :  { %954 = dma.done.wait [#allocation3], 1024  }
  0x26   :  { %955 = vsyncadd [#allocation3], 4294966272 }
  0x27   :  { %956 = dma.done.wait [#allocation6], 2048  }
  0x28   :  { %957 = vsyncadd [#allocation6], 4294965248  ;;  %v967_v0 = vmov 0.0   ;;  %vm968_vm0 = vmmov 0   ;;  %v1010_v1 = vld [vmem:[#allocation5 + $0x38] sm:$0xff]   ;;  %v1013_v2 = vld [vmem:[#allocation5 + $0x30] sm:$0xff]  }
  0x29   :  { %668 = vmatprep.subr.bf16.mxu0 %v967_v0  ;;  %684 = vmatprep.mubr.msk.bf16.mxu0 %vm968_vm0, %v967_v0  ;;  %v1019_v3 = vld [vmem:[#allocation5 + $0x28] sm:$0xff]   ;;  %v1024_v4 = vld [vmem:[#allocation5 + $0x20] sm:$0xff]   ;;  %v1031_v6 = vld [vmem:[#allocation5 + $0x18] sm:$0xff]   ;;  %s969_s7 = smov [#allocation8]  }
  0x2a   :  { %688 = vmatprep.subr.bf16.mxu1 %v967_v0  ;;  %704 = vmatprep.mubr.msk.bf16.mxu1 %vm968_vm0, %v967_v0  ;;  %v76_v5 = vld [vmem:[#allocation2] sm:$0xff]  ;;  %v1037_v7 = vld [vmem:[#allocation5 + $0x10] sm:$0xff]   ;;  %v1043_v8 = vld [vmem:[#allocation5 + $0x8] sm:$0xff]   ;;  %s569_s8 = sshll.u32 %s969_s7, 4  ;;  %s570_s8 = int_to_ptr.vmem [resolvable:$true] %s569_s8 }
  0x2b   :  { %669 = vmatpush3.bf16.msra.mxu0 %v1010_v1  ;;  %689 = vmatpush3.bf16.msra.mxu1 %v1010_v1  ;;  %854 = vtanh.f32 %v76_v5  ;;  %v1049_v10 = vld [vmem:[#allocation5] sm:$0xff]   ;;  %v80_v12 = vld [vmem:[#allocation2 + $0x8] sm:$0xff]  ;;  %v173_v20 = vld [vmem:[#allocation2 + $0x10] sm:$0xff]  ;;  %p939_p2 = scmp.lt.s32.totalorder %s570_s8, %s570_s8 }
  0x2c   :  { %670 = vmatprep.subr.bf16.mxu0 %v967_v0  ;;  %690 = vmatprep.subr.bf16.mxu1 %v967_v0  ;;  %v218_v28 = vld [vmem:[#allocation2 + $0x18] sm:$0xff]  ;;  %v263_v36 = vld [vmem:[#allocation2 + $0x20] sm:$0xff]  ;;  %v308_v44 = vld [vmem:[#allocation2 + $0x28] sm:$0xff] }
  0x2d   :  { %v846_v52 = vld [vmem:[#allocation7 + $0x38] sm:$0xff]   ;;  %v847_v53 = vld [vmem:[#allocation7 + $0x30] sm:$0xff]   ;;  %v848_v54 = vld [vmem:[#allocation7 + $0x28] sm:$0xff]  }
  0x2e   :  { %v353_v55 = vld [vmem:[#allocation2 + $0x30] sm:$0xff]  ;;  %v849_v63 = vld [vmem:[#allocation7 + $0x20] sm:$0xff]   ;;  %v398_v5 = vld [vmem:[#allocation2 + $0x38] sm:$0xff] }
  0x2f   :  { %671 = vmatpush3.bf16.msra.mxu0 %v1013_v2  ;;  %691 = vmatpush3.bf16.msra.mxu1 %v1013_v2 }
  0x30   :  { %672 = vmatprep.subr.bf16.mxu0 %v967_v0  ;;  %692 = vmatprep.subr.bf16.mxu1 %v967_v0 }
  0x33   :  { %673 = vmatpush3.bf16.msra.mxu0 %v1019_v3  ;;  %693 = vmatpush3.bf16.msra.mxu1 %v1019_v3 }
  0x34   :  { %674 = vmatprep.subr.bf16.mxu0 %v967_v0  ;;  %694 = vmatprep.subr.bf16.mxu1 %v967_v0 }
  0x37   :  { %675 = vmatpush3.bf16.msra.mxu0 %v1024_v4  ;;  %695 = vmatpush3.bf16.msra.mxu1 %v1024_v4 }
  0x38   :  { %676 = vmatprep.subr.bf16.mxu0 %v967_v0  ;;  %696 = vmatprep.subr.bf16.mxu1 %v967_v0  ;;  %v855_v9 = vpop.eup %854 }
  0x39   :  { %v78_v11 = vpack.c.bf16 %v855_v9, %v855_v9 }
  0x3b   :  { %677 = vmatpush3.bf16.msra.mxu0 %v1031_v6  ;;  %697 = vmatpush3.bf16.msra.mxu1 %v1031_v6 }
  0x3c   :  { %678 = vmatprep.subr.bf16.mxu0 %v967_v0  ;;  %698 = vmatprep.subr.bf16.mxu1 %v967_v0 }
  0x3f   :  { %679 = vmatpush3.bf16.msra.mxu0 %v1037_v7  ;;  %699 = vmatpush3.bf16.msra.mxu1 %v1037_v7 }
  0x40   :  { %680 = vmatprep.subr.bf16.mxu0 %v967_v0  ;;  %700 = vmatprep.subr.bf16.mxu1 %v967_v0 }
  0x43   :  { %681 = vmatpush3.bf16.msra.mxu0 %v1043_v8  ;;  %701 = vmatpush3.bf16.msra.mxu1 %v1043_v8 }
  0x44   :  { %682 = vmatprep.subr.bf16.mxu0 %v967_v0  ;;  %702 = vmatprep.subr.bf16.mxu1 %v967_v0 }
  0x47   :  { %683 = vmatpush3.bf16.msra.mxu0 %v1049_v10  ;;  %703 = vmatpush3.bf16.msra.mxu1 %v1049_v10 }
  0x48   :  { %708 = vmatprep.subr.bf16.mxu0 %v967_v0  ;;  %728 = vmatprep.subr.bf16.mxu1 %v967_v0 }
  0x4a   :  { %685 = vmatmul.mubr.bf16.vlgmr.msra.gmra.mxu0 %v78_v11 }
  0x4b   :  { %709 = vmatpush3.bf16.msra.mxu0 %v1010_v1  ;;  %724 = vmatprep.mubr.msk.bf16.mxu0 %vm968_vm0, %v967_v0 }
  0x4c   :  { %710 = vmatprep.subr.bf16.mxu0 %v967_v0 }
  0x4f   :  { %711 = vmatpush3.bf16.msra.mxu0 %v1013_v2 }
  0x50   :  { %712 = vmatprep.subr.bf16.mxu0 %v967_v0 }
  0x53   :  { %713 = vmatpush3.bf16.msra.mxu0 %v1019_v3 }
  0x54   :  { %714 = vmatprep.subr.bf16.mxu0 %v967_v0 }
  0x57   :  { %715 = vmatpush3.bf16.msra.mxu0 %v1024_v4 }
  0x58   :  { %716 = vmatprep.subr.bf16.mxu0 %v967_v0 }
  0x5b   :  { %717 = vmatpush3.bf16.msra.mxu0 %v1031_v6 }
  0x5c   :  { %718 = vmatprep.subr.bf16.mxu0 %v967_v0 }
  0x5f   :  { %719 = vmatpush3.bf16.msra.mxu0 %v1037_v7 }
  0x60   :  { %720 = vmatprep.subr.bf16.mxu0 %v967_v0 }
  0x63   :  { %721 = vmatpush3.bf16.msra.mxu0 %v1043_v8 }
  0x64   :  { %722 = vmatprep.subr.bf16.mxu0 %v967_v0 }
  0x67   :  { %723 = vmatpush3.bf16.msra.mxu0 %v1049_v10 }
  0x68   :  { %748 = vmatprep.subr.bf16.mxu0 %v967_v0 }
 0x10a   :  { %v163_v13 = vpop.f32.mrf.mxu0 }
 0x10b   :  { %v169_v14 = vadd.f32 %v163_v13, %v80_v12  ;;  %v587_v13 = vld [vmem:[%s1165_s3] ss:$0 sm:$0xff]  ;;  %s934_s3 = scalar_lea.vmem %s570_s8, 128 }
 0x10c   :  { %v686_v15 = vpop.f32.mrf.mxu0  ;;  %p935_p1 = scmp.ne.s32.totalorder %s570_s8, %s934_s3  ;;  %p940_p3 = scmp.lt.s32.totalorder %s934_s3, %s934_s3 }
 0x10d   :  { %856 = vtanh.f32 %v169_v14 }
 0x10e   :  { %v166_v16 = vpop.f32.mrf.mxu0  ;;  %p941_p4 = por %p940_p3, %p939_p2 }
 0x110   :  { %v687_v17 = vpop.f32.mrf.mxu0  ;;  %p942_p5 = pnand %p941_p4, %p935_p1 }
 0x11a   :  { %v857_v18 = vpop.eup %856 }
 0x11b   :  { %v171_v19 = vpack.c.bf16 %v857_v18, %v857_v18 }
 0x11d   :  { %705 = vmatmul.mubr.bf16.vlgmr.msra.gmra.mxu1 %v171_v19 }
 0x11e   :  { %729 = vmatpush3.bf16.msra.mxu1 %v1010_v1  ;;  %744 = vmatprep.mubr.msk.bf16.mxu1 %vm968_vm0, %v967_v0 }
 0x11f   :  { %730 = vmatprep.subr.bf16.mxu1 %v967_v0 }
 0x122   :  { %731 = vmatpush3.bf16.msra.mxu1 %v1013_v2 }
 0x123   :  { %732 = vmatprep.subr.bf16.mxu1 %v967_v0 }
 0x126   :  { %733 = vmatpush3.bf16.msra.mxu1 %v1019_v3 }
 0x127   :  { %734 = vmatprep.subr.bf16.mxu1 %v967_v0 }
 0x12a   :  { %735 = vmatpush3.bf16.msra.mxu1 %v1024_v4 }
 0x12b   :  { %736 = vmatprep.subr.bf16.mxu1 %v967_v0 }
 0x12e   :  { %737 = vmatpush3.bf16.msra.mxu1 %v1031_v6 }
 0x12f   :  { %738 = vmatprep.subr.bf16.mxu1 %v967_v0 }
 0x132   :  { %739 = vmatpush3.bf16.msra.mxu1 %v1037_v7 }
 0x133   :  { %740 = vmatprep.subr.bf16.mxu1 %v967_v0 }
 0x136   :  { %741 = vmatpush3.bf16.msra.mxu1 %v1043_v8 }
 0x137   :  { %742 = vmatprep.subr.bf16.mxu1 %v967_v0 }
 0x13a   :  { %743 = vmatpush3.bf16.msra.mxu1 %v1049_v10 }
 0x13b   :  { %768 = vmatprep.subr.bf16.mxu1 %v967_v0 }
 0x1dd   :  { %v208_v21 = vpop.f32.mrf.mxu1 }
 0x1de   :  { %v214_v22 = vadd.f32 %v208_v21, %v173_v20 }
 0x1df   :  { %v706_v23 = vpop.f32.mrf.mxu1 }
 0x1e0   :  { %858 = vtanh.f32 %v214_v22 }
 0x1e1   :  { %v211_v24 = vpop.f32.mrf.mxu1 }
 0x1e3   :  { %v707_v25 = vpop.f32.mrf.mxu1 }
 0x1ed   :  { %v859_v26 = vpop.eup %858 }
 0x1ee   :  { %v216_v27 = vpack.c.bf16 %v859_v26, %v859_v26 }
 0x1f0   :  { %725 = vmatmul.mubr.bf16.vlgmr.msra.gmra.mxu0 %v216_v27 }
 0x1f1   :  { %749 = vmatpush3.bf16.msra.mxu0 %v1010_v1  ;;  %764 = vmatprep.mubr.msk.bf16.mxu0 %vm968_vm0, %v967_v0 }
 0x1f2   :  { %750 = vmatprep.subr.bf16.mxu0 %v967_v0 }
 0x1f5   :  { %751 = vmatpush3.bf16.msra.mxu0 %v1013_v2 }
 0x1f6   :  { %752 = vmatprep.subr.bf16.mxu0 %v967_v0 }
 0x1f9   :  { %753 = vmatpush3.bf16.msra.mxu0 %v1019_v3 }
 0x1fa   :  { %754 = vmatprep.subr.bf16.mxu0 %v967_v0 }
 0x1fd   :  { %755 = vmatpush3.bf16.msra.mxu0 %v1024_v4 }
 0x1fe   :  { %756 = vmatprep.subr.bf16.mxu0 %v967_v0 }
 0x201   :  { %757 = vmatpush3.bf16.msra.mxu0 %v1031_v6 }
 0x202   :  { %758 = vmatprep.subr.bf16.mxu0 %v967_v0 }
 0x205   :  { %759 = vmatpush3.bf16.msra.mxu0 %v1037_v7 }
 0x206   :  { %760 = vmatprep.subr.bf16.mxu0 %v967_v0 }
 0x209   :  { %761 = vmatpush3.bf16.msra.mxu0 %v1043_v8 }
 0x20a   :  { %762 = vmatprep.subr.bf16.mxu0 %v967_v0 }
 0x20d   :  { %763 = vmatpush3.bf16.msra.mxu0 %v1049_v10 }
 0x20e   :  { %788 = vmatprep.subr.bf16.mxu0 %v967_v0 }
 0x2b0   :  { %v253_v29 = vpop.f32.mrf.mxu0 }
 0x2b1   :  { %v259_v30 = vadd.f32 %v253_v29, %v218_v28 }
 0x2b2   :  { %v726_v31 = vpop.f32.mrf.mxu0 }
 0x2b3   :  { %860 = vtanh.f32 %v259_v30 }
 0x2b4   :  { %v256_v32 = vpop.f32.mrf.mxu0 }
 0x2b6   :  { %v727_v33 = vpop.f32.mrf.mxu0 }
 0x2c0   :  { %v861_v34 = vpop.eup %860 }
 0x2c1   :  { %v261_v35 = vpack.c.bf16 %v861_v34, %v861_v34 }
 0x2c3   :  { %745 = vmatmul.mubr.bf16.vlgmr.msra.gmra.mxu1 %v261_v35 }
 0x2c4   :  { %769 = vmatpush3.bf16.msra.mxu1 %v1010_v1  ;;  %784 = vmatprep.mubr.msk.bf16.mxu1 %vm968_vm0, %v967_v0 }
 0x2c5   :  { %770 = vmatprep.subr.bf16.mxu1 %v967_v0 }
 0x2c8   :  { %771 = vmatpush3.bf16.msra.mxu1 %v1013_v2 }
 0x2c9   :  { %772 = vmatprep.subr.bf16.mxu1 %v967_v0 }
 0x2cc   :  { %773 = vmatpush3.bf16.msra.mxu1 %v1019_v3 }
 0x2cd   :  { %774 = vmatprep.subr.bf16.mxu1 %v967_v0 }
 0x2d0   :  { %775 = vmatpush3.bf16.msra.mxu1 %v1024_v4 }
 0x2d1   :  { %776 = vmatprep.subr.bf16.mxu1 %v967_v0 }
 0x2d4   :  { %777 = vmatpush3.bf16.msra.mxu1 %v1031_v6 }
 0x2d5   :  { %778 = vmatprep.subr.bf16.mxu1 %v967_v0 }
 0x2d8   :  { %779 = vmatpush3.bf16.msra.mxu1 %v1037_v7 }
 0x2d9   :  { %780 = vmatprep.subr.bf16.mxu1 %v967_v0 }
 0x2dc   :  { %781 = vmatpush3.bf16.msra.mxu1 %v1043_v8 }
 0x2dd   :  { %782 = vmatprep.subr.bf16.mxu1 %v967_v0 }
 0x2e0   :  { %783 = vmatpush3.bf16.msra.mxu1 %v1049_v10 }
 0x2e1   :  { %808 = vmatprep.subr.bf16.mxu1 %v967_v0 }
 0x383   :  { %v298_v37 = vpop.f32.mrf.mxu1 }
 0x384   :  { %v304_v38 = vadd.f32 %v298_v37, %v263_v36 }
 0x385   :  { %v746_v39 = vpop.f32.mrf.mxu1 }
 0x386   :  { %862 = vtanh.f32 %v304_v38 }
 0x387   :  { %v301_v40 = vpop.f32.mrf.mxu1 }
 0x389   :  { %v747_v41 = vpop.f32.mrf.mxu1 }
 0x393   :  { %v863_v42 = vpop.eup %862 }
 0x394   :  { %v306_v43 = vpack.c.bf16 %v863_v42, %v863_v42 }
 0x396   :  { %765 = vmatmul.mubr.bf16.vlgmr.msra.gmra.mxu0 %v306_v43 }
 0x397   :  { %789 = vmatpush3.bf16.msra.mxu0 %v1010_v1  ;;  %804 = vmatprep.mubr.msk.bf16.mxu0 %vm968_vm0, %v967_v0  ;;  %v850_v1 = vld [vmem:[#allocation7 + $0x18] sm:$0xff]  }
 0x398   :  { %790 = vmatprep.subr.bf16.mxu0 %v967_v0 }
 0x39b   :  { %791 = vmatpush3.bf16.msra.mxu0 %v1013_v2  ;;  %v851_v2 = vld [vmem:[#allocation7 + $0x10] sm:$0xff]  }
 0x39c   :  { %792 = vmatprep.subr.bf16.mxu0 %v967_v0 }
 0x39f   :  { %793 = vmatpush3.bf16.msra.mxu0 %v1019_v3  ;;  %v852_v3 = vld [vmem:[#allocation7 + $0x8] sm:$0xff]  }
 0x3a0   :  { %794 = vmatprep.subr.bf16.mxu0 %v967_v0 }
 0x3a3   :  { %795 = vmatpush3.bf16.msra.mxu0 %v1024_v4  ;;  %v853_v4 = vld [vmem:[#allocation7] sm:$0xff]  }
 0x3a4   :  { %796 = vmatprep.subr.bf16.mxu0 %v967_v0 }
 0x3a7   :  { %797 = vmatpush3.bf16.msra.mxu0 %v1031_v6 }
 0x3a8   :  { %798 = vmatprep.subr.bf16.mxu0 %v967_v0 }
 0x3ab   :  { %799 = vmatpush3.bf16.msra.mxu0 %v1037_v7 }
 0x3ac   :  { %800 = vmatprep.subr.bf16.mxu0 %v967_v0 }
 0x3af   :  { %801 = vmatpush3.bf16.msra.mxu0 %v1043_v8 }
 0x3b0   :  { %802 = vmatprep.subr.bf16.mxu0 %v967_v0 }
 0x3b3   :  { %803 = vmatpush3.bf16.msra.mxu0 %v1049_v10 }
 0x456   :  { %v343_v45 = vpop.f32.mrf.mxu0 }
 0x457   :  { %v349_v46 = vadd.f32 %v343_v45, %v308_v44 }
 0x458   :  { %v766_v47 = vpop.f32.mrf.mxu0 }
 0x459   :  { %864 = vtanh.f32 %v349_v46 }
 0x45a   :  { %v346_v48 = vpop.f32.mrf.mxu0 }
 0x45c   :  { %v767_v49 = vpop.f32.mrf.mxu0 }
 0x466   :  { %v865_v50 = vpop.eup %864 }
 0x467   :  { %v351_v51 = vpack.c.bf16 %v865_v50, %v865_v50 }
 0x469   :  { %785 = vmatmul.mubr.bf16.vlgmr.msra.gmra.mxu1 %v351_v51 }
 0x46a   :  { %824 = vmatprep.mubr.msk.bf16.mxu1 %vm968_vm0, %v967_v0  ;;  %809 = vmatpush3.bf16.msra.mxu1 %v846_v52 }
 0x46b   :  { %810 = vmatprep.subr.bf16.mxu1 %v967_v0 }
 0x46e   :  { %811 = vmatpush3.bf16.msra.mxu1 %v847_v53 }
 0x46f   :  { %812 = vmatprep.subr.bf16.mxu1 %v967_v0 }
 0x472   :  { %813 = vmatpush3.bf16.msra.mxu1 %v848_v54 }
 0x473   :  { %814 = vmatprep.subr.bf16.mxu1 %v967_v0 }
 0x476   :  { %815 = vmatpush3.bf16.msra.mxu1 %v849_v63 }
 0x477   :  { %816 = vmatprep.subr.bf16.mxu1 %v967_v0 }
 0x47a   :  { %817 = vmatpush3.bf16.msra.mxu1 %v850_v1 }
 0x47b   :  { %818 = vmatprep.subr.bf16.mxu1 %v967_v0 }
 0x47e   :  { %819 = vmatpush3.bf16.msra.mxu1 %v851_v2 }
 0x47f   :  { %820 = vmatprep.subr.bf16.mxu1 %v967_v0 }
 0x482   :  { %821 = vmatpush3.bf16.msra.mxu1 %v852_v3 }
 0x483   :  { %822 = vmatprep.subr.bf16.mxu1 %v967_v0 }
 0x486   :  { %823 = vmatpush3.bf16.msra.mxu1 %v853_v4 }
 0x529   :  { %v388_v56 = vpop.f32.mrf.mxu1 }
 0x52a   :  { %v394_v57 = vadd.f32 %v388_v56, %v353_v55 }
 0x52b   :  { %v786_v58 = vpop.f32.mrf.mxu1 }
 0x52c   :  { %866 = vtanh.f32 %v394_v57 }
 0x52d   :  { %v391_v59 = vpop.f32.mrf.mxu1 }
 0x52f   :  { %v787_v60 = vpop.f32.mrf.mxu1 }
 0x539   :  { %v867_v61 = vpop.eup %866 }
 0x53a   :  { %v396_v62 = vpack.c.bf16 %v867_v61, %v867_v61 }
 0x53c   :  { %805 = vmatmul.mubr.bf16.vlgmr.msra.gmra.mxu0 %v396_v62 }
 0x5fc   :  { %v433_v6 = vpop.f32.mrf.mxu0 }
 0x5fd   :  { %v439_v7 = vadd.f32 %v433_v6, %v398_v5 }
 0x5fe   :  { %v806_v8 = vpop.f32.mrf.mxu0 }
 0x5ff   :  { %868 = vtanh.f32 %v439_v7 }
 0x600   :  { %v436_v9 = vpop.f32.mrf.mxu0 }
 0x602   :  { %v807_v10 = vpop.f32.mrf.mxu0 }
 0x60c   :  { %v869_v11 = vpop.eup %868 }
 0x60d   :  { %v441_v12 = vpack.c.bf16 %v869_v11, %v869_v11 }
 0x60f   :  { %825 = vmatmul.mubr.bf16.vlgmr.msra.gmra.mxu1 %v441_v12 }
 0x6cf   :  { %v547_v14 = vpop.f32.mrf.mxu1 }
 0x6d0   :  { %v548_v15 = vadd.f32 %v587_v13, %v547_v14 }
 0x6d1   :  { %v826_v16 = vpop.f32.mrf.mxu1 }
 0x6d2   :  { %553 = vmax.xlane.f32.xlu0 %v548_v15 }
 0x6d3   :  { %v550_v0 = vpop.f32.mrf.mxu1 }
 0x6d5   :  { %v827_v17 = vpop.f32.mrf.mxu1 }
 0x75b   :  { %v554_v18 = vpop.xlane.xlu0 %553 }
 0x75c   :  { %v555_v19 = vsub.f32 %v548_v15, %v554_v18 }
 0x75e   :  { %v556_v20 = vmul.f32 1.442695, %v555_v19 }
 0x760   :  { %870 = vpow2.f32 %v556_v20 }
 0x76d   :  { %v871_v21 = vpop.eup %870 }
 0x76e   :  { %558 = vadd.xlane.f32.xlu0 %v871_v21 }
 0x7f7   :  { %v559_v22 = vpop.xlane.xlu0 %558 }
 0x7f8   :  { %872 = vrcp.f32 %v559_v22 }
 0x805   :  { %v873_v23 = vpop.eup %872 }
 0x806   :  { %v561_v24 = vmul.f32 %v873_v23, %v871_v21 }
 0x808   :  { %562 = vst [vmem:[#allocation8] sm:$0xff] %v561_v24 }
 0x809   :  { %945 = shalt.err (!%p942_p5)
}
 0x80a   :  { %572 = dma.vmem_to_hbm [thread:$0]  %s570_s8, 128, %s1166_s4, [#allocation4]  }
 0x80b   :  { %958 = dma.done.wait [#allocation4], 128  }
 0x80c   :  { %959 = vsyncadd [#allocation4], 4294967168 }
 0x80d   :  { %576 = vsyncpa [#allocation3], 1 }
 0x80e   :  { %577 = vsyncpa [#allocation6], 1 }
 0x80f   :  { %578 = vsyncpa [#allocation4], 1 }

</bundles_post_ra>
